<compile_context>
chip_gen: v7x
topology: tpu7x:2x2x1
jax: 0.10.0
libtpu: 0.0.40
codegen_flags: <defaults>
</compile_context>

<pallas_src>
from functools import partial

import numpy as np
import jax
import jax.numpy as jnp
from jax import lax
from jax.experimental import pallas as pl
from jax.experimental.pallas import tpu as pltpu

BIN_STEP = 0.1
NUM_CLASSES = 10
NUM_BINS = 10          # edges arange(0, 1.1, 0.1) -> 10 bins
NB_PAD = 16            # one-hot rows (bins padded to 16 sublanes for the MXU dot)
OUT_ROWS = 8           # output slab rows; rows 0..2 = counts / corrects / conf-sums
OUT_LANES = 128        # output slab lanes; lanes 0..9 = bins (full lane-dense vreg)
TILE = 8192            # samples (lane axis) per grid step
KCHUNK = 512           # samples per in-register chunk (one-hot stays in vregs)


def _tensorcores_per_device() -> int:
    """Best-effort query of TensorCores per JAX device (2 on v7x megacore)."""
    try:
        return max(1, int(getattr(jax.devices()[0], "num_cores", 1)))
    except Exception:
        return 1


_NUM_CORES = _tensorcores_per_device()
_USE_CORE_PARALLEL = (_NUM_CORES > 1) and hasattr(pltpu, "CORE_PARALLEL")


def ece_hist_kernel(probs_ref, labels_ref, hist_ref):
    """Accumulate per-bin (count, corrects, confidence-sum) for one (C, TILE) tile.

    probs_ref  : (C, TILE) f32 — classes on sublanes, samples on lanes (lane-dense)
    labels_ref : (1, TILE) i32 — lane-dense labels (-1 for padded columns)
    hist_ref   : (OUT_ROWS, OUT_LANES) f32 accumulator block, resident across the
                 "arbitrary" sample axis. rows 0/1/2 = counts / corrects / conf-sums.
    """
    @pl.when(pl.program_id(1) == 0)
    def _init():
        hist_ref[...] = jnp.zeros_like(hist_ref)

    num_classes, tile = probs_ref.shape
    n_chunks = tile // KCHUNK

    # Hoisted constants (JAX does not CSE broadcast_in_dim -> build once).
    cls_iota = lax.broadcasted_iota(jnp.int32, (num_classes, KCHUNK), 0)
    bin_iota = lax.broadcasted_iota(jnp.int32, (NB_PAD, KCHUNK), 0)
    ones_row = jnp.ones((1, KCHUNK), jnp.float32)

    def chunk_body(k, partial_acc):
        k0 = pl.multiple_of(k * KCHUNK, KCHUNK)
        p_k = probs_ref[:, pl.ds(k0, KCHUNK)]          # (C, K) f32, lane-dense
        lab_k = labels_ref[:, pl.ds(k0, KCHUNK)]       # (1, K) i32 (-1 on padding)

        # argmax over the class (sublane) axis; first-match like np.argmax.
        pmax = jnp.max(p_k, axis=0, keepdims=True)                             # (1, K)
        pred = jnp.min(jnp.where(p_k == pmax, cls_iota, num_classes),
                       axis=0, keepdims=True)                                  # (1, K)
        hit = pred == lab_k                                                    # (1, K)

        # correct[c, t] = 1 iff c == labels[t] == pred[t]
        # (matches the reference's target_OH * (pred_OH == target_OH) product).
        correct = jnp.logical_and(cls_iota == lab_k, hit).astype(jnp.float32)  # (C, K)

        # Closed-form np.digitize(p, arange(0, 1.1, 0.1), right=True) - 1.
        # Padded columns (p = -1) get bin -11 -> match no bin.
        bin_idx = jnp.ceil(p_k * jnp.float32(NUM_BINS)).astype(jnp.int32) - 1  # (C, K)

        # Per class: build the (NB_PAD, K) one-hot in vregs and consume it right
        # away on the MXU — never materialize a (C, NB_PAD, T) tensor.
        for c in range(num_classes):
            onehot_c = (bin_idx[c:c + 1, :] == bin_iota).astype(jnp.float32)   # (NB_PAD, K)
            stats_c = jnp.concatenate(
                [ones_row, correct[c:c + 1, :], p_k[c:c + 1, :]], axis=0)      # (3, K)
            # Contract over the sample (lane) axis: (3, K) x (NB_PAD, K)^T -> (3, NB_PAD)
            partial_acc = partial_acc + lax.dot_general(
                stats_c, onehot_c,
                dimension_numbers=(((1,), (1,)), ((), ())),
                preferred_element_type=jnp.float32)
        return partial_acc

    partial = lax.fori_loop(0, n_chunks, chunk_body,
                            jnp.zeros((3, NB_PAD), jnp.float32))

    # Single small RMW into the VMEM-resident (8, 128) output block per grid step.
    hist_ref[0:3, 0:NB_PAD] += partial


@partial(jax.jit, static_argnames=("tile", "num_cores", "core_parallel"))
def _ece_histogram(probs, labels, *, tile, num_cores, core_parallel):
    """Combined histogram, shape (3, NUM_BINS) f32.
       rows: 0 = bin counts, 1 = bin corrects, 2 = bin confidence sums."""
    probs = jnp.asarray(probs, jnp.float32)
    labels = jnp.asarray(labels, jnp.int32)
    n, c = probs.shape

    chunk = tile * num_cores
    n_pad = ((n + chunk - 1) // chunk) * chunk
    # Lane-dense (C, N) layout; pad samples with p = -1 (bin -11, outside every bin)
    # and label = -1 (never matches a class) -> no in-kernel masking needed.
    # TODO(synk): fuse this transpose/pad into the upstream producer of `probs` to
    # drop the extra HBM pass (perf-review item 8); not expressible in a
    # self-contained script.
    probs_t = jnp.full((c, n_pad), -1.0, jnp.float32).at[:, :n].set(probs.T)
    labels_p = jnp.full((1, n_pad), -1, jnp.int32).at[0, :n].set(labels)

    tiles_per_core = n_pad // chunk
    grid = (num_cores, tiles_per_core)

    if core_parallel:
        dim_sem = (pltpu.CORE_PARALLEL, pltpu.ARBITRARY)   # v7x: engage both TCs
    else:
        dim_sem = ("parallel", "arbitrary")

    hist = pl.pallas_call(
        ece_hist_kernel,
        out_shape=jax.ShapeDtypeStruct((num_cores, OUT_ROWS, OUT_LANES), jnp.float32),
        grid=grid,
        in_specs=[
            pl.BlockSpec((c, tile), lambda ci, ti: (0, ci * tiles_per_core + ti)),
            pl.BlockSpec((1, tile), lambda ci, ti: (0, ci * tiles_per_core + ti)),
        ],
        out_specs=pl.BlockSpec((None, OUT_ROWS, OUT_LANES), lambda ci, ti: (ci, 0, 0)),
        compiler_params=pltpu.CompilerParams(
            dimension_semantics=dim_sem,
            vmem_limit_bytes=32 * 1024 * 1024,
        ),
    )(probs_t, labels_p)

    return jnp.sum(hist, axis=0)[:3, :NUM_BINS]      # (3, NUM_BINS)


def ece_histogram(probs, labels, *, tile=TILE):
    return _ece_histogram(probs, labels, tile=tile,
                          num_cores=_NUM_CORES, core_parallel=_USE_CORE_PARALLEL)


class ECELoss:
    """Expected calibration error; histogram reductions run in the Pallas kernel."""

    def __init__(self, bin_step=0.1, num_classes=10):
        assert bin_step == BIN_STEP and num_classes == NUM_CLASSES
        self.bin_step = bin_step
        self.num_classes = num_classes

    def forward(self, probs, labels):
        hist_d = ece_histogram(probs, labels)                 # (3, 10) on device
        hist = np.asarray(hist_d, dtype=np.float64)           # single small transfer
        bin_counts, bin_corrects, bin_conf_sum = hist[0], hist[1], hist[2]

        bins = np.arange(0, 1.1, self.bin_step)
        bin_centers = bins[1:] - self.bin_step / 2
        with np.errstate(invalid="ignore", divide="ignore"):
            bin_confidence = bin_conf_sum / bin_counts        # NaN if bin empty (== np.mean of empty)
        have_data = bin_counts > 0
        bin_acc = bin_corrects[have_data] / bin_counts[have_data]
        ece = 0.0
        total = np.sum(bin_counts)
        for i in range(len(bin_confidence)):
            ece += np.absolute(bin_confidence[i] - bin_acc[i]) * bin_counts[i] / total
        return (ece, bin_centers[have_data], bin_acc)


# ---------------- pure NumPy reference (mirrors the PyTorch module) ----------------
def get_one_hot(targets, nb_classes):
    res = np.eye(nb_classes)[np.array(targets).reshape(-1)]
    return res.reshape(list(targets.shape) + [nb_classes])


def numpy_reference(probs, labels, bin_step=0.1, num_classes=10):
    probs = np.asarray(probs)
    labels = np.asarray(labels)
    pred_class = np.argmax(probs, axis=1)
    expanded_preds = np.reshape(probs, -1)
    pred_class_OH = np.reshape(get_one_hot(pred_class, num_classes), -1)
    target_class_OH = np.reshape(get_one_hot(labels, num_classes), -1)
    correct_vec = (target_class_OH * (pred_class_OH == target_class_OH)).astype(int)
    bins = np.arange(0, 1.1, bin_step)
    bin_idxs = np.digitize(expanded_preds, bins, right=True) - 1
    bin_centers = bins[1:] - bin_step / 2
    bin_counts = np.ones(len(bin_centers))
    bin_corrects = np.zeros(len(bin_centers))
    bin_confidence = np.zeros(len(bin_centers))
    for nbin in range(len(bin_centers)):
        bin_counts[nbin] = np.sum((bin_idxs == nbin).astype(int))
        bin_corrects[nbin] = np.sum(correct_vec[bin_idxs == nbin])
        bin_confidence[nbin] = np.mean(expanded_preds[bin_idxs == nbin])
    have_data = bin_counts > 0
    bin_acc = bin_corrects[have_data] / bin_counts[have_data]
    ece = 0
    for i in range(len(bin_confidence)):
        ece += np.absolute(bin_confidence[i] - bin_acc[i]) * bin_counts[i] / np.sum(bin_counts)
    return (ece, bin_centers[have_data], bin_acc)


if __name__ == "__main__":
    N, C = 8, NUM_CLASSES
    key = jax.random.PRNGKey(0)
    k1, k2, k3 = jax.random.split(key, 3)

    # Deterministic "probabilities" spanning (0, 1) so every confidence bin is
    # populated (the reference indexes the compacted bin_acc by bin id and assumes this).
    base = jnp.linspace(0.03, 0.98, N * C, dtype=jnp.float32)
    noise = jax.random.uniform(k1, (N * C,), minval=-0.02, maxval=0.02)
    perm = jax.random.permutation(k2, N * C)
    probs = (base + noise)[perm].reshape(N, C).astype(jnp.float32)
    labels = jax.random.randint(k3, (N,), 0, C, dtype=jnp.int32)

    # Run the Pallas kernel once and block on its result.
    hist = ece_histogram(probs, labels)
    jax.block_until_ready(hist)

    # Full forward (kernel + tiny NumPy tail) vs. pure NumPy reference.
    ece, centers, acc = ECELoss().forward(probs, labels)
    ece_ref, centers_ref, acc_ref = numpy_reference(np.asarray(probs), np.asarray(labels))

    assert np.allclose(ece, ece_ref, rtol=1e-5, atol=1e-6), (ece, ece_ref)
    assert centers.shape == centers_ref.shape and np.allclose(centers, centers_ref)
    assert acc.shape == acc_ref.shape and np.allclose(acc, acc_ref, rtol=1e-5, atol=1e-6)

    print("KERNEL_OK")
</pallas_src>

<mosaic_0001>
module attributes {stable_mosaic.version = 11 : i64} {
  func.func @ece_hist_kernel(%arg0: i32, %arg1: i32, %arg2: memref<10x8192xf32, #tpu.memory_space<vmem>>, %arg3: memref<1x8192xi32, #tpu.memory_space<vmem>>, %arg4: memref<1x8x128xf32, #tpu.memory_space<vmem>>) attributes {dimension_semantics = [#tpu.dimension_semantics<parallel>, #tpu.dimension_semantics<arbitrary>], iteration_bounds = array<i64: 1, 1>, scalar_prefetch = 0 : i64, scratch_operands = 0 : i64, tpu.core_type = #tpu.core_type<tc>, window_params = [{transform_indices = @transform_0, window_bounds = array<i64: 10, 8192>}, {transform_indices = @transform_1, window_bounds = array<i64: 1, 8192>}, {transform_indices = @transform_2, window_bounds = array<i64: 1, 8, 128>}]} {
    %c0_i32 = arith.constant 0 : i32
    %0 = arith.cmpi eq, %arg1, %c0_i32 : i32
    %1 = arith.extui %0 : i1 to i32
    %c0_i32_0 = arith.constant 0 : i32
    %2 = arith.cmpi ne, %1, %c0_i32_0 : i32
    scf.if %2 {
      %cst_9 = arith.constant 0.000000e+00 : f32
      %15 = vector.broadcast %cst_9 : f32 to vector<8x128xf32>
      %c0_10 = arith.constant 0 : index
      %c0_11 = arith.constant 0 : index
      %c0_12 = arith.constant 0 : index
      %16 = vector.load %arg4[%c0_10, %c0_11, %c0_12] : memref<1x8x128xf32, #tpu.memory_space<vmem>>, vector<1x8x128xf32>
      %17 = vector.shape_cast %16 : vector<1x8x128xf32> to vector<8x128xf32>
      %18 = vector.shape_cast %15 : vector<8x128xf32> to vector<1x8x128xf32>
      tpu.vector_store %arg4[%c0_10, %c0_11, %c0_12], %18 {strides = array<i32>} : memref<1x8x128xf32, #tpu.memory_space<vmem>>, vector<1x8x128xf32>,
    } else {
    }
    %3 = tpu.iota {dimensions = array<i32: 0>} : vector<10x512xi32>
    %4 = tpu.iota {dimensions = array<i32: 0>} : vector<16x512xi32>
    %cst = arith.constant 1.000000e+00 : f32
    %5 = vector.broadcast %cst : f32 to vector<1x512xf32>
    %cst_1 = arith.constant 0.000000e+00 : f32
    %6 = vector.broadcast %cst_1 : f32 to vector<3x16xf32>
    %c0_i32_2 = arith.constant 0 : i32
    %c16_i32 = arith.constant 16 : i32
    %7 = arith.addi %c0_i32_2, %c16_i32 : i32
    %c1_i32 = arith.constant 1 : i32
    %8 = scf.for %arg5 = %c0_i32_2 to %7 step %c1_i32 iter_args(%arg6 = %6) -> (vector<3x16xf32>)  : i32 {
      %c512_i32 = arith.constant 512 : i32
      %15 = arith.muli %arg5, %c512_i32 : i32
      %16 = tpu.assume_multiple %15, 512 : i32
      %c0_9 = arith.constant 0 : index
      %17 = arith.index_cast %16 : i32 to index
      %18 = vector.load %arg2[%c0_9, %17] : memref<10x8192xf32, #tpu.memory_space<vmem>>, vector<10x512xf32>
      %c0_10 = arith.constant 0 : index
      %19 = arith.index_cast %16 : i32 to index
      %20 = vector.load %arg3[%c0_10, %19] : memref<1x8192xi32, #tpu.memory_space<vmem>>, vector<1x512xi32>
      %cst_11 = arith.constant dense<0xFF800000> : vector<512xf32>
      %21 = vector.multi_reduction <maximumf>, %18, %cst_11 [0] : vector<10x512xf32> to vector<512xf32>
      %22 = vector.shape_cast %21 : vector<512xf32> to vector<1x512xf32>
      %23 = vector.broadcast %22 : vector<1x512xf32> to vector<10x512xf32>
      %24 = arith.cmpf oeq, %18, %23 : vector<10x512xf32>
      %c10_i32 = arith.constant 10 : i32
      %25 = vector.broadcast %c10_i32 : i32 to vector<10x512xi32>
      %26 = arith.select %24, %3, %25 : vector<10x512xi1>, vector<10x512xi32>
      %cst_12 = arith.constant dense<2147483647> : vector<512xi32>
      %27 = vector.multi_reduction <minsi>, %26, %cst_12 [0] : vector<10x512xi32> to vector<512xi32>
      %28 = vector.shape_cast %27 : vector<512xi32> to vector<1x512xi32>
      %29 = arith.cmpi eq, %28, %20 : vector<1x512xi32>
      %30 = vector.broadcast %20 : vector<1x512xi32> to vector<10x512xi32>
      %31 = arith.cmpi eq, %3, %30 : vector<10x512xi32>
      %32 = vector.broadcast %29 : vector<1x512xi1> to vector<10x512xi1>
      %33 = arith.andi %31, %32 : vector<10x512xi1>
      %34 = arith.extui %33 : vector<10x512xi1> to vector<10x512xi32>
      %35 = arith.sitofp %34 : vector<10x512xi32> to vector<10x512xf32>
      %cst_13 = arith.constant 1.000000e+01 : f32
      %36 = vector.broadcast %cst_13 : f32 to vector<10x512xf32>
      %37 = arith.mulf %18, %36 : vector<10x512xf32>
      %38 = math.ceil %37 : vector<10x512xf32>
      %39 = arith.fptosi %38 : vector<10x512xf32> to vector<10x512xi32>
      %c1_i32_14 = arith.constant 1 : i32
      %40 = vector.broadcast %c1_i32_14 : i32 to vector<10x512xi32>
      %41 = arith.subi %39, %40 : vector<10x512xi32>
      %42 = vector.extract_strided_slice %41 {offsets = [0, 0], sizes = [1, 512], strides = [1, 1]} : vector<10x512xi32> to vector<1x512xi32>
      %43 = vector.broadcast %42 : vector<1x512xi32> to vector<16x512xi32>
      %44 = arith.cmpi eq, %43, %4 : vector<16x512xi32>
      %45 = arith.extui %44 : vector<16x512xi1> to vector<16x512xi32>
      %46 = arith.sitofp %45 : vector<16x512xi32> to vector<16x512xf32>
      %47 = vector.extract_strided_slice %35 {offsets = [0, 0], sizes = [1, 512], strides = [1, 1]} : vector<10x512xf32> to vector<1x512xf32>
      %48 = vector.extract_strided_slice %18 {offsets = [0, 0], sizes = [1, 512], strides = [1, 1]} : vector<10x512xf32> to vector<1x512xf32>
      %49 = tpu.concatenate %5, %47, %48 in 0 : vector<1x512xf32>, vector<1x512xf32>, vector<1x512xf32> -> vector<3x512xf32>
      %cst_15 = arith.constant dense<0.000000e+00> : vector<3x16xf32>
      %50 = tpu.matmul %49, %46, %cst_15 {dimension_numbers = #tpu.dot_dimension_numbers<[1], [1], [0], [0], [0, 0, 1, 0], [], []>} : vector<3x512xf32>, vector<16x512xf32>, vector<3x16xf32> -> vector<3x16xf32>
      %51 = arith.addf %arg6, %50 : vector<3x16xf32>
      %52 = vector.extract_strided_slice %41 {offsets = [1, 0], sizes = [1, 512], strides = [1, 1]} : vector<10x512xi32> to vector<1x512xi32>
      %53 = vector.broadcast %52 : vector<1x512xi32> to vector<16x512xi32>
      %54 = arith.cmpi eq, %53, %4 : vector<16x512xi32>
      %55 = arith.extui %54 : vector<16x512xi1> to vector<16x512xi32>
      %56 = arith.sitofp %55 : vector<16x512xi32> to vector<16x512xf32>
      %57 = vector.extract_strided_slice %35 {offsets = [1, 0], sizes = [1, 512], strides = [1, 1]} : vector<10x512xf32> to vector<1x512xf32>
      %58 = vector.extract_strided_slice %18 {offsets = [1, 0], sizes = [1, 512], strides = [1, 1]} : vector<10x512xf32> to vector<1x512xf32>
      %59 = tpu.concatenate %5, %57, %58 in 0 : vector<1x512xf32>, vector<1x512xf32>, vector<1x512xf32> -> vector<3x512xf32>
      %cst_16 = arith.constant dense<0.000000e+00> : vector<3x16xf32>
      %60 = tpu.matmul %59, %56, %cst_16 {dimension_numbers = #tpu.dot_dimension_numbers<[1], [1], [0], [0], [0, 0, 1, 0], [], []>} : vector<3x512xf32>, vector<16x512xf32>, vector<3x16xf32> -> vector<3x16xf32>
      %61 = arith.addf %51, %60 : vector<3x16xf32>
      %62 = vector.extract_strided_slice %41 {offsets = [2, 0], sizes = [1, 512], strides = [1, 1]} : vector<10x512xi32> to vector<1x512xi32>
      %63 = vector.broadcast %62 : vector<1x512xi32> to vector<16x512xi32>
      %64 = arith.cmpi eq, %63, %4 : vector<16x512xi32>
      %65 = arith.extui %64 : vector<16x512xi1> to vector<16x512xi32>
      %66 = arith.sitofp %65 : vector<16x512xi32> to vector<16x512xf32>
      %67 = vector.extract_strided_slice %35 {offsets = [2, 0], sizes = [1, 512], strides = [1, 1]} : vector<10x512xf32> to vector<1x512xf32>
      %68 = vector.extract_strided_slice %18 {offsets = [2, 0], sizes = [1, 512], strides = [1, 1]} : vector<10x512xf32> to vector<1x512xf32>
      %69 = tpu.concatenate %5, %67, %68 in 0 : vector<1x512xf32>, vector<1x512xf32>, vector<1x512xf32> -> vector<3x512xf32>
      %cst_17 = arith.constant dense<0.000000e+00> : vector<3x16xf32>
      %70 = tpu.matmul %69, %66, %cst_17 {dimension_numbers = #tpu.dot_dimension_numbers<[1], [1], [0], [0], [0, 0, 1, 0], [], []>} : vector<3x512xf32>, vector<16x512xf32>, vector<3x16xf32> -> vector<3x16xf32>
      %71 = arith.addf %61, %70 : vector<3x16xf32>
      %72 = vector.extract_strided_slice %41 {offsets = [3, 0], sizes = [1, 512], strides = [1, 1]} : vector<10x512xi32> to vector<1x512xi32>
      %73 = vector.broadcast %72 : vector<1x512xi32> to vector<16x512xi32>
      %74 = arith.cmpi eq, %73, %4 : vector<16x512xi32>
      %75 = arith.extui %74 : vector<16x512xi1> to vector<16x512xi32>
      %76 = arith.sitofp %75 : vector<16x512xi32> to vector<16x512xf32>
      %77 = vector.extract_strided_slice %35 {offsets = [3, 0], sizes = [1, 512], strides = [1, 1]} : vector<10x512xf32> to vector<1x512xf32>
      %78 = vector.extract_strided_slice %18 {offsets = [3, 0], sizes = [1, 512], strides = [1, 1]} : vector<10x512xf32> to vector<1x512xf32>
      %79 = tpu.concatenate %5, %77, %78 in 0 : vector<1x512xf32>, vector<1x512xf32>, vector<1x512xf32> -> vector<3x512xf32>
      %cst_18 = arith.constant dense<0.000000e+00> : vector<3x16xf32>
      %80 = tpu.matmul %79, %76, %cst_18 {dimension_numbers = #tpu.dot_dimension_numbers<[1], [1], [0], [0], [0, 0, 1, 0], [], []>} : vector<3x512xf32>, vector<16x512xf32>, vector<3x16xf32> -> vector<3x16xf32>
      %81 = arith.addf %71, %80 : vector<3x16xf32>
      %82 = vector.extract_strided_slice %41 {offsets = [4, 0], sizes = [1, 512], strides = [1, 1]} : vector<10x512xi32> to vector<1x512xi32>
      %83 = vector.broadcast %82 : vector<1x512xi32> to vector<16x512xi32>
      %84 = arith.cmpi eq, %83, %4 : vector<16x512xi32>
      %85 = arith.extui %84 : vector<16x512xi1> to vector<16x512xi32>
      %86 = arith.sitofp %85 : vector<16x512xi32> to vector<16x512xf32>
      %87 = vector.extract_strided_slice %35 {offsets = [4, 0], sizes = [1, 512], strides = [1, 1]} : vector<10x512xf32> to vector<1x512xf32>
      %88 = vector.extract_strided_slice %18 {offsets = [4, 0], sizes = [1, 512], strides = [1, 1]} : vector<10x512xf32> to vector<1x512xf32>
      %89 = tpu.concatenate %5, %87, %88 in 0 : vector<1x512xf32>, vector<1x512xf32>, vector<1x512xf32> -> vector<3x512xf32>
      %cst_19 = arith.constant dense<0.000000e+00> : vector<3x16xf32>
      %90 = tpu.matmul %89, %86, %cst_19 {dimension_numbers = #tpu.dot_dimension_numbers<[1], [1], [0], [0], [0, 0, 1, 0], [], []>} : vector<3x512xf32>, vector<16x512xf32>, vector<3x16xf32> -> vector<3x16xf32>
      %91 = arith.addf %81, %90 : vector<3x16xf32>
      %92 = vector.extract_strided_slice %41 {offsets = [5, 0], sizes = [1, 512], strides = [1, 1]} : vector<10x512xi32> to vector<1x512xi32>
      %93 = vector.broadcast %92 : vector<1x512xi32> to vector<16x512xi32>
      %94 = arith.cmpi eq, %93, %4 : vector<16x512xi32>
      %95 = arith.extui %94 : vector<16x512xi1> to vector<16x512xi32>
      %96 = arith.sitofp %95 : vector<16x512xi32> to vector<16x512xf32>
      %97 = vector.extract_strided_slice %35 {offsets = [5, 0], sizes = [1, 512], strides = [1, 1]} : vector<10x512xf32> to vector<1x512xf32>
      %98 = vector.extract_strided_slice %18 {offsets = [5, 0], sizes = [1, 512], strides = [1, 1]} : vector<10x512xf32> to vector<1x512xf32>
      %99 = tpu.concatenate %5, %97, %98 in 0 : vector<1x512xf32>, vector<1x512xf32>, vector<1x512xf32> -> vector<3x512xf32>
      %cst_20 = arith.constant dense<0.000000e+00> : vector<3x16xf32>
      %100 = tpu.matmul %99, %96, %cst_20 {dimension_numbers = #tpu.dot_dimension_numbers<[1], [1], [0], [0], [0, 0, 1, 0], [], []>} : vector<3x512xf32>, vector<16x512xf32>, vector<3x16xf32> -> vector<3x16xf32>
      %101 = arith.addf %91, %100 : vector<3x16xf32>
      %102 = vector.extract_strided_slice %41 {offsets = [6, 0], sizes = [1, 512], strides = [1, 1]} : vector<10x512xi32> to vector<1x512xi32>
      %103 = vector.broadcast %102 : vector<1x512xi32> to vector<16x512xi32>
      %104 = arith.cmpi eq, %103, %4 : vector<16x512xi32>
      %105 = arith.extui %104 : vector<16x512xi1> to vector<16x512xi32>
      %106 = arith.sitofp %105 : vector<16x512xi32> to vector<16x512xf32>
      %107 = vector.extract_strided_slice %35 {offsets = [6, 0], sizes = [1, 512], strides = [1, 1]} : vector<10x512xf32> to vector<1x512xf32>
      %108 = vector.extract_strided_slice %18 {offsets = [6, 0], sizes = [1, 512], strides = [1, 1]} : vector<10x512xf32> to vector<1x512xf32>
      %109 = tpu.concatenate %5, %107, %108 in 0 : vector<1x512xf32>, vector<1x512xf32>, vector<1x512xf32> -> vector<3x512xf32>
      %cst_21 = arith.constant dense<0.000000e+00> : vector<3x16xf32>
      %110 = tpu.matmul %109, %106, %cst_21 {dimension_numbers = #tpu.dot_dimension_numbers<[1], [1], [0], [0], [0, 0, 1, 0], [], []>} : vector<3x512xf32>, vector<16x512xf32>, vector<3x16xf32> -> vector<3x16xf32>
      %111 = arith.addf %101, %110 : vector<3x16xf32>
      %112 = vector.extract_strided_slice %41 {offsets = [7, 0], sizes = [1, 512], strides = [1, 1]} : vector<10x512xi32> to vector<1x512xi32>
      %113 = vector.broadcast %112 : vector<1x512xi32> to vector<16x512xi32>
      %114 = arith.cmpi eq, %113, %4 : vector<16x512xi32>
      %115 = arith.extui %114 : vector<16x512xi1> to vector<16x512xi32>
      %116 = arith.sitofp %115 : vector<16x512xi32> to vector<16x512xf32>
      %117 = vector.extract_strided_slice %35 {offsets = [7, 0], sizes = [1, 512], strides = [1, 1]} : vector<10x512xf32> to vector<1x512xf32>
      %118 = vector.extract_strided_slice %18 {offsets = [7, 0], sizes = [1, 512], strides = [1, 1]} : vector<10x512xf32> to vector<1x512xf32>
      %119 = tpu.concatenate %5, %117, %118 in 0 : vector<1x512xf32>, vector<1x512xf32>, vector<1x512xf32> -> vector<3x512xf32>
      %cst_22 = arith.constant dense<0.000000e+00> : vector<3x16xf32>
      %120 = tpu.matmul %119, %116, %cst_22 {dimension_numbers = #tpu.dot_dimension_numbers<[1], [1], [0], [0], [0, 0, 1, 0], [], []>} : vector<3x512xf32>, vector<16x512xf32>, vector<3x16xf32> -> vector<3x16xf32>
      %121 = arith.addf %111, %120 : vector<3x16xf32>
      %122 = vector.extract_strided_slice %41 {offsets = [8, 0], sizes = [1, 512], strides = [1, 1]} : vector<10x512xi32> to vector<1x512xi32>
      %123 = vector.broadcast %122 : vector<1x512xi32> to vector<16x512xi32>
      %124 = arith.cmpi eq, %123, %4 : vector<16x512xi32>
      %125 = arith.extui %124 : vector<16x512xi1> to vector<16x512xi32>
      %126 = arith.sitofp %125 : vector<16x512xi32> to vector<16x512xf32>
      %127 = vector.extract_strided_slice %35 {offsets = [8, 0], sizes = [1, 512], strides = [1, 1]} : vector<10x512xf32> to vector<1x512xf32>
      %128 = vector.extract_strided_slice %18 {offsets = [8, 0], sizes = [1, 512], strides = [1, 1]} : vector<10x512xf32> to vector<1x512xf32>
      %129 = tpu.concatenate %5, %127, %128 in 0 : vector<1x512xf32>, vector<1x512xf32>, vector<1x512xf32> -> vector<3x512xf32>
      %cst_23 = arith.constant dense<0.000000e+00> : vector<3x16xf32>
      %130 = tpu.matmul %129, %126, %cst_23 {dimension_numbers = #tpu.dot_dimension_numbers<[1], [1], [0], [0], [0, 0, 1, 0], [], []>} : vector<3x512xf32>, vector<16x512xf32>, vector<3x16xf32> -> vector<3x16xf32>
      %131 = arith.addf %121, %130 : vector<3x16xf32>
      %132 = vector.extract_strided_slice %41 {offsets = [9, 0], sizes = [1, 512], strides = [1, 1]} : vector<10x512xi32> to vector<1x512xi32>
      %133 = vector.broadcast %132 : vector<1x512xi32> to vector<16x512xi32>
      %134 = arith.cmpi eq, %133, %4 : vector<16x512xi32>
      %135 = arith.extui %134 : vector<16x512xi1> to vector<16x512xi32>
      %136 = arith.sitofp %135 : vector<16x512xi32> to vector<16x512xf32>
      %137 = vector.extract_strided_slice %35 {offsets = [9, 0], sizes = [1, 512], strides = [1, 1]} : vector<10x512xf32> to vector<1x512xf32>
      %138 = vector.extract_strided_slice %18 {offsets = [9, 0], sizes = [1, 512], strides = [1, 1]} : vector<10x512xf32> to vector<1x512xf32>
      %139 = tpu.concatenate %5, %137, %138 in 0 : vector<1x512xf32>, vector<1x512xf32>, vector<1x512xf32> -> vector<3x512xf32>
      %cst_24 = arith.constant dense<0.000000e+00> : vector<3x16xf32>
      %140 = tpu.matmul %139, %136, %cst_24 {dimension_numbers = #tpu.dot_dimension_numbers<[1], [1], [0], [0], [0, 0, 1, 0], [], []>} : vector<3x512xf32>, vector<16x512xf32>, vector<3x16xf32> -> vector<3x16xf32>
      %141 = arith.addf %131, %140 : vector<3x16xf32>
      scf.yield %141 : vector<3x16xf32>
    }
    %c16_i32_3 = arith.constant 16 : i32
    %c0 = arith.constant 0 : index
    %c0_4 = arith.constant 0 : index
    %c0_5 = arith.constant 0 : index
    %9 = vector.load %arg4[%c0, %c0_4, %c0_5] : memref<1x8x128xf32, #tpu.memory_space<vmem>>, vector<1x3x16xf32>
    %10 = vector.shape_cast %9 : vector<1x3x16xf32> to vector<3x16xf32>
    %11 = arith.addf %10, %8 : vector<3x16xf32>
    %c0_6 = arith.constant 0 : index
    %c0_7 = arith.constant 0 : index
    %c0_8 = arith.constant 0 : index
    %12 = vector.load %arg4[%c0_6, %c0_7, %c0_8] : memref<1x8x128xf32, #tpu.memory_space<vmem>>, vector<1x3x16xf32>
    %13 = vector.shape_cast %12 : vector<1x3x16xf32> to vector<3x16xf32>
    %14 = vector.shape_cast %11 : vector<3x16xf32> to vector<1x3x16xf32>
    tpu.vector_store %arg4[%c0_6, %c0_7, %c0_8], %14 {strides = array<i32>} : memref<1x8x128xf32, #tpu.memory_space<vmem>>, vector<1x3x16xf32>,
    return
  }
  func.func @transform_0(%arg0: i32, %arg1: i32) -> (i32, i32) {
    %c1_i32 = arith.constant 1 : i32
    %0 = arith.muli %arg0, %c1_i32 : i32
    %1 = arith.addi %0, %arg1 : i32
    %c0_i32 = arith.constant 0 : i32
    %c0_i32_0 = arith.constant 0 : i32
    return %c0_i32, %1 : i32, i32
  }
  func.func @transform_1(%arg0: i32, %arg1: i32) -> (i32, i32) {
    %c1_i32 = arith.constant 1 : i32
    %0 = arith.muli %arg0, %c1_i32 : i32
    %1 = arith.addi %0, %arg1 : i32
    %c0_i32 = arith.constant 0 : i32
    %c0_i32_0 = arith.constant 0 : i32
    return %c0_i32, %1 : i32, i32
  }
  func.func @transform_2(%arg0: i32, %arg1: i32) -> (i32, i32, i32) {
    %c0_i32 = arith.constant 0 : i32
    %c0_i32_0 = arith.constant 0 : i32
    %c0_i32_1 = arith.constant 0 : i32
    return %arg0, %c0_i32, %c0_i32_0 : i32, i32, i32
  }
}

</mosaic_0001>

<bundles_post_ra>
// kernel: _ece_histogram.1
= control target key start
LH: loop header
LB: loop body
LE: loop exit
PB: predicated region body
PF: predicated region fallthrough
CT: control target
= control target key end

     0   :  { %v57_v0 = vlaneseq  ;;  %v2713_v1 = vmov 0.0   ;;  %v2740_v4 = vmov 0.0   ;;  %s2742_s11 = smov 0   ;;  %s3624_s0 = inlined_call_operand.vmem [shape: f32[10,8192], index: 0, kind: input, shape index: {}]   ;;  %s3625_s1 = inlined_call_operand.vmem [shape: s32[1,8192], index: 1, kind: input, shape index: {}]   ;;  %s3626_s2 = inlined_call_operand.vmem [shape: f32[1,8,128], index: 2, kind: output, shape index: {}]  }
   0x1   :  { %56 = vst [vmem:[%s3626_s2] sm:$0xff] %v2713_v1 }
   0x2   :  { %v2735_v2 = vshrl.u32 %v57_v0, 7 }
   0x4   :  { %v2738_v3 = vadd.s32 8, %v2735_v2 }
   0x5 LB: > { %s2358_s12 = sshll.u32 %s2711_s11, 9  ;;  %vm3627_vm0 = vcmask 1041408   ;;  %v2790_v23 = vsub.s32 0, %v2735_v2  ;;  %v2796_v33 = vsub.s32 5, %v2735_v2  ;;  %v2714_v53 = vmov 1.0|1.0   ;;  %s2711_s11 = sphi %s2742_s11, %s65_s11   ;;  %v2707_v4 = vphi %v2740_v4, %v3712_v4  }
   0x6   : > { %s2751_s13 = sshra.s32 %s2358_s12, 7  ;;  %v2830_v56 = vsub.s32 1, %v2735_v2  ;;  %s65_s11 = sadd.s32 1, %s2711_s11  }
   0x7   : > { %s2359_s14 = sshll.u32 %s2751_s13, 3  ;;  %s80_s20 = scalar_lea.vmem %s3625_s1, %s2751_s13 }
   0x8   : > { %s2757_s17 = scalar_lea.vmem %s3624_s0, %s2359_s14  ;;  %v2855_v0 = vld [vmem:[%s80_s20] sm:$0xf]  ;;  %p62_p0 = scmp.ge.s32.totalorder %s65_s11, 16  }
   0x9   : > { %v2760_v5 = vld [vmem:[%s2757_s17 + $0x8] sm:$0xff]  ;;  %v2763_v6 = vld [vmem:[%s2757_s17] sm:$0xff]  ;;  %v2773_v11 = vld [vmem:[%s2757_s17 + $0x18] sm:$0xff] }
   0xa   : > { %v2766_v7 = vld [vmem:[%s2757_s17 + $0x208] sm:$0x3]  ;;  %v256_v8 = vmul.f32 10.0, %v2760_v5  ;;  %v255_v9 = vmul.f32 10.0, %v2763_v6  ;;  %v258_v13 = vmul.f32 10.0, %v2773_v11  ;;  %v2787_v22 = vld [vmem:[%s2757_s17 + $0x10] sm:$0xff] }
   0xb   : > { %v91_v10 = vsel %vm3627_vm0, %v2766_v7, -inf  ;;  %v2778_v14 = vld [vmem:[%s2757_s17 + $0x200] sm:$0x3]  ;;  %v2783_v18 = vld [vmem:[%s2757_s17 + $0x218] sm:$0x3]  ;;  %v257_v26 = vmul.f32 10.0, %v2787_v22 }
   0xc   : > { %v92_v12 = vmax.f32 %v2760_v5, %v91_v10  ;;  %v264_v15 = vceil.f32 %v256_v8  ;;  %v263_v16 = vceil.f32 %v255_v9  ;;  %v83_v17 = vsel %vm3627_vm0, %v2778_v14, -inf }
   0xd   : > { %v266_v20 = vceil.f32 %v258_v13  ;;  %v84_v21 = vmax.f32 %v2763_v6, %v83_v17  ;;  %v107_v30 = vsel %vm3627_vm0, %v2783_v18, -inf  ;;  %v265_v34 = vceil.f32 %v257_v26  ;;  %v2865_v13 = vld [vmem:[%s2757_s17 + $0x210] sm:$0x3] }
   0xe   : > { %v93_v19 = vrot.slane %v92_v12, 4  ;;  %v2656_v24 = vtrunc.f32 %v264_v15  ;;  %v2654_v25 = vtrunc.f32 %v263_v16  ;;  %v108_v38 = vmax.f32 %v2773_v11, %v107_v30 }
   0xf   : > { %v2660_v28 = vtrunc.f32 %v266_v20  ;;  %v85_v29 = vrot.slane %v84_v21, 4  ;;  %v2805_v44 = vtrunc.f32 %v265_v34  ;;  %v2869_v17 = vrot.slane %v2855_v0, %v2830_v56 }
  0x10   : > { %v94_v27 = vmax.f32 %v92_v12, %v93_v19  ;;  %v2657_v31 = vcvt.f32.s32 %v2656_v24  ;;  %v2655_v32 = vcvt.f32.s32 %v2654_v25  ;;  %v109_v52 = vrot.slane %v108_v38, 4 }
  0x11   : > { %v2661_v36 = vcvt.f32.s32 %v2660_v28  ;;  %v86_v37 = vmax.f32 %v84_v21, %v85_v29  ;;  %v2659_v59 = vcvt.f32.s32 %v2805_v44  ;;  %v2862_v12 = vsub.s32 3, %v2735_v2 }
  0x12   : > { %v95_v35 = vrot.slane %v94_v27, 2  ;;  %v2799_v39 = vadd.s32 4294967295, %v2657_v31  ;;  %v2801_v40 = vadd.s32 4294967295, %v2655_v32  ;;  %v110_v62 = vmax.f32 %v108_v38, %v109_v52 }
  0x13   : > { %v2803_v42 = vadd.s32 4294967295, %v2661_v36  ;;  %v87_v43 = vrot.slane %v86_v37, 2  ;;  %v2871_v20 = vadd.s32 4294967295, %v2659_v59  ;;  %v2874_v21 = vsub.s32 6, %v2735_v2 }
  0x14   : > { %v96_v41 = vmax.f32 %v94_v27, %v95_v35  ;;  %v294_v45 = vrot.slane %v2799_v39, %v2790_v23  ;;  %v290_v46 = vrot.slane %v2801_v40, %v2790_v23  ;;  %v1312_v47 = vrot.slane %v2799_v39, %v2796_v33 }
  0x15   : > { %v1308_v48 = vrot.slane %v2801_v40, %v2796_v33  ;;  %v302_v50 = vrot.slane %v2803_v42, %v2790_v23  ;;  %v88_v51 = vmax.f32 %v86_v37, %v87_v43  ;;  %v1320_v57 = vrot.slane %v2803_v42, %v2796_v33 }
  0x16   : > { %v97_v49 = vrot.slane %v96_v41, 1  ;;  %vm304_vm1 = vcmp.eq.s32.totalorder %v294_v45, %v2735_v2  ;;  %vm308_vm2 = vcmp.eq.s32.totalorder %v294_v45, %v2738_v3  ;;  %vm303_vm3 = vcmp.eq.s32.totalorder %v290_v46, %v2735_v2 }
  0x17   : > { %vm307_vm4 = vcmp.eq.s32.totalorder %v290_v46, %v2738_v3  ;;  %vm2536_vm5 = vmpackc.low %vm308_vm2, %vm304_vm1  ;;  %vm1322_vm6 = vcmp.eq.s32.totalorder %v1312_v47, %v2735_v2  ;;  %vm1326_vm7 = vcmp.eq.s32.totalorder %v1312_v47, %v2738_v3  ;;  %vm1321_vm8 = vcmp.eq.s32.totalorder %v1308_v48, %v2735_v2 }
  0x18   : > { %vm1325_vm9 = vcmp.eq.s32.totalorder %v1308_v48, %v2738_v3  ;;  %2537 = vmatprep.subr.msk.bf16.mxu1 %vm2536_vm5, %v2714_v53  ;;  %vm2538_vm10 = vmpackc.low %vm307_vm4, %vm303_vm3  ;;  %v98_v54 = vmax.f32 %v96_v41, %v97_v49  ;;  %vm306_vm11 = vcmp.eq.s32.totalorder %v302_v50, %v2735_v2  ;;  %vm310_vm12 = vcmp.eq.s32.totalorder %v302_v50, %v2738_v3 }
  0x19   : > { %v89_v55 = vrot.slane %v88_v51, 1  ;;  %2539 = vmatpush1.bf16.xpose.msk.msra.mxu1 %vm2538_vm10, %v2714_v53  ;;  %vm2576_vm13 = vmpackc.low %vm1326_vm7, %vm1322_vm6  ;;  %vm1324_vm3 = vcmp.eq.s32.totalorder %v1320_v57, %v2735_v2  ;;  %vm1328_vm6 = vcmp.eq.s32.totalorder %v1320_v57, %v2738_v3  ;;  %v111_v16 = vrot.slane %v110_v62, 2 }
  0x1a   : > { %2577 = vmatprep.subr.msk.bf16.mxu0 %vm2576_vm13, %v2714_v53  ;;  %vm2578_vm14 = vmpackc.low %vm1325_vm9, %vm1321_vm8  ;;  %vm116_vm15 = vcmp.eq.f32.partialorder %v2760_v5, %v98_v54  ;;  %vm120_vm1 = vcmp.eq.f32.partialorder %v2766_v7, %v98_v54  ;;  %v99_v26 = vsel %vm3627_vm0, %v2865_v13, -inf  ;;  %v2880_v28 = vrot.slane %v2855_v0, %v2790_v23 }
  0x1b   : > { %v90_v58 = vmax.f32 %v88_v51, %v89_v55  ;;  %2579 = vmatpush1.bf16.xpose.msk.msra.mxu0 %vm2578_vm14, %v2714_v53  ;;  %v124_v60 = vsel %vm116_vm15, %v2735_v2, 10  ;;  %v128_v61 = vsel %vm120_vm1, %v2738_v3, 10  ;;  %vm2540_vm2 = vmpackc.low %vm310_vm12, %vm306_vm11  ;;  %v112_v25 = vmax.f32 %v110_v62, %v111_v16 }
  0x1c   : > { %v143_v63 = vsel %vm3627_vm0, %v128_v61, 2147483647  ;;  %2541 = vmatprep.subr.msk.bf16.mxu1 %vm2540_vm2, %v2714_v53  ;;  %vm2580_vm8 = vmpackc.low %vm1328_vm6, %vm1324_vm3  ;;  %v2884_v29 = vrot.slane %v2855_v0, %v2862_v12  ;;  %v100_v30 = vmax.f32 %v2787_v22, %v99_v26  ;;  %v344_v32 = vrot.slane %v2760_v5, 6 }
  0x1d   : > { %vm115_vm4 = vcmp.eq.f32.partialorder %v2763_v6, %v90_v58  ;;  %vm119_vm5 = vcmp.eq.f32.partialorder %v2778_v14, %v90_v58  ;;  %vm144_vm7 = vcmp.lt.s32.totalorder %v124_v60, %v143_v63  ;;  %2581 = vmatprep.subr.msk.bf16.mxu0 %vm2580_vm8, %v2714_v53  ;;  %v113_v34 = vrot.slane %v112_v25, 1 }
  0x1e   : > { %v123_v1 = vsel %vm115_vm4, %v2735_v2, 10  ;;  %v127_v8 = vsel %vm119_vm5, %v2738_v3, 10  ;;  %v145_v9 = vsel %vm144_vm7, %v124_v60, %v143_v63  ;;  %v1354_v35 = vrot.slane %v2760_v5, 3 }
  0x1f   : > { %v131_v10 = vsel %vm3627_vm0, %v127_v8, 2147483647  ;;  %v146_v15 = vrot.slane %v145_v9, 4  ;;  %v343_v37 = vrot.slane %v2763_v6, 6  ;;  %v101_v38 = vrot.slane %v100_v30, 4 }
  0x20   : > { %vm132_vm9 = vcmp.lt.s32.totalorder %v123_v1, %v131_v10  ;;  %vm200_vm13 = vcmp.eq.s32.totalorder %v2735_v2, %v2869_v17  ;;  %v2894_v43 = vrot.slane %v2871_v20, %v2790_v23  ;;  %v114_v44 = vmax.f32 %v112_v25, %v113_v34 }
  0x21   : > { %v133_v19 = vsel %vm132_vm9, %v123_v1, %v131_v10  ;;  %vm147_vm10 = vcmp.lt.s32.totalorder %v145_v9, %v146_v15  ;;  %v1353_v46 = vrot.slane %v2763_v6, 3  ;;  %v2899_v47 = vrot.slane %v2799_v39, %v2830_v56 }
  0x22   : > { %v134_v24 = vrot.slane %v133_v19, 4  ;;  %v148_v27 = vsel %vm147_vm10, %v145_v9, %v146_v15  ;;  %v102_v48 = vmax.f32 %v100_v30, %v101_v38  ;;  %vm199_vm15 = vcmp.eq.s32.totalorder %v2735_v2, %v2880_v28 }
  0x23   : > { %v149_v31 = vrot.slane %v148_v27, 2  ;;  %vm118_vm1 = vcmp.eq.f32.partialorder %v2773_v11, %v114_v44  ;;  %vm122_vm2 = vcmp.eq.f32.partialorder %v2783_v18, %v114_v44  ;;  %vm351_vm4 = vcmask 1040384  }
  0x24   : > { %vm135_vm11 = vcmp.lt.s32.totalorder %v133_v19, %v134_v24  ;;  %v126_v51 = vsel %vm118_vm1, %v2735_v2, 10  ;;  %v130_v52 = vsel %vm122_vm2, %v2738_v3, 10  ;;  %v103_v54 = vrot.slane %v102_v48, 2 }
  0x25   : > { %v136_v36 = vsel %vm135_vm11, %v133_v19, %v134_v24  ;;  %vm150_vm12 = vcmp.lt.s32.totalorder %v148_v27, %v149_v31  ;;  %vm305_vm5 = vcmp.eq.s32.totalorder %v2894_v43, %v2735_v2  ;;  %v1316_v57 = vrot.slane %v2871_v20, %v2796_v33 }
  0x26   : > { %v137_v41 = vrot.slane %v136_v36, 2  ;;  %v151_v45 = vsel %vm150_vm12, %v148_v27, %v149_v31  ;;  %v167_v58 = vsel %vm3627_vm0, %v130_v52, 2147483647  ;;  %vm309_vm6 = vcmp.eq.s32.totalorder %v2894_v43, %v2738_v3 }
  0x27   : > { %v152_v49 = vrot.slane %v151_v45, 1  ;;  %vm168_vm7 = vcmp.lt.s32.totalorder %v126_v51, %v167_v58  ;;  %v104_v60 = vmax.f32 %v102_v48, %v103_v54  ;;  %v1517_v62 = vrot.slane %v2799_v39, %v2874_v21 }
  0x28   : > { %vm138_vm14 = vcmp.lt.s32.totalorder %v136_v36, %v137_v41  ;;  %v169_v61 = vsel %vm168_vm7, %v126_v51, %v167_v58  ;;  %v2715_v63 = vmov 0   ;;  %vm1323_vm11 = vcmp.eq.s32.totalorder %v1316_v57, %v2735_v2 }
  0x29   : > { %v139_v50 = vsel %vm138_vm14, %v136_v36, %v137_v41  ;;  %vm153_vm3 = vcmp.lt.s32.totalorder %v151_v45, %v152_v49  ;;  %v170_v33 = vrot.slane %v169_v61, 4  ;;  %v105_v9 = vrot.slane %v104_v60, 1 }
  0x2a   : > { %v140_v55 = vrot.slane %v139_v50, 1  ;;  %v154_v59 = vsel %vm153_vm3, %v151_v45, %v152_v49  ;;  %vm518_vm12 = vcmp.eq.s32.totalorder %v2899_v47, %v2735_v2  ;;  %vm1327_vm14 = vcmp.eq.s32.totalorder %v1316_v57, %v2738_v3 }
  0x2b   : > { %vm196_vm8 = vcmp.eq.s32.totalorder %v154_v59, %v2869_v17  ;;  %vm171_vm1 = vcmp.lt.s32.totalorder %v169_v61, %v170_v33  ;;  %v106_v16 = vmax.f32 %v104_v60, %v105_v9  ;;  %vm522_vm3 = vcmp.eq.s32.totalorder %v2899_v47, %v2738_v3 }
  0x2c   : > { %vm141_vm9 = vcmp.lt.s32.totalorder %v139_v50, %v140_v55  ;;  %v208_v1 = vsel %vm196_vm8, 1, %v2715_v63  ;;  %v172_v25 = vsel %vm171_vm1, %v169_v61, %v170_v33  ;;  %v2716_v27 = vmov 0.0  }
  0x2d   : > { %v142_v8 = vsel %vm141_vm9, %v139_v50, %v140_v55  ;;  %v218_v10 = vrot.slane %v208_v1, %v2790_v23  ;;  %v173_v26 = vrot.slane %v172_v25, 2  ;;  %vm117_vm8 = vcmp.eq.f32.partialorder %v2787_v22, %v106_v16 }
  0x2e   : > { %vm195_vm10 = vcmp.eq.s32.totalorder %v142_v8, %v2880_v28  ;;  %vm121_vm9 = vcmp.eq.f32.partialorder %v2865_v13, %v106_v16  ;;  %v125_v34 = vsel %vm117_vm8, %v2735_v2, 10  ;;  %v542_v52 = vrot.slane %v2760_v5, 7 }
  0x2f   : > { %v207_v15 = vsel %vm195_vm10, 1, %v2715_v63  ;;  %vm2925_vm2 = vcmp.eq.s32.totalorder %v218_v10, 1  ;;  %vm1527_vm10 = vcmp.eq.s32.totalorder %v1517_v62, %v2735_v2  ;;  %v129_v36 = vsel %vm121_vm9, %v2738_v3, 10 }
  0x30   : > { %v214_v24 = vrot.slane %v207_v15, %v2790_v23  ;;  %vm232_vm7 = vmand %vm200_vm13, %vm2925_vm2  ;;  %v155_v44 = vsel %vm3627_vm0, %v129_v36, 2147483647  ;;  %vm1531_vm9 = vcmp.eq.s32.totalorder %v1517_v62, %v2738_v3  ;;  %v3017_v62 = vsub.s32 2, %v2735_v2 }
  0x31   : > { %v2941_v30 = vsel %vm232_vm7, 1.0, %v2716_v27  ;;  %vm174_vm7 = vcmp.lt.s32.totalorder %v172_v25, %v173_v26  ;;  %vm156_vm8 = vcmp.lt.s32.totalorder %v125_v34, %v155_v44  ;;  %v3042_v36 = vsub.s32 4, %v2735_v2 }
  0x32   : > { %vm2943_vm1 = vcmp.eq.s32.totalorder %v214_v24, 1  ;;  %v332_v38 = vrot.slane %v2941_v30, 7  ;;  %v1346_v41 = vrot.slane %v2941_v30, 4  ;;  %v175_v48 = vsel %vm174_vm7, %v172_v25, %v173_v26 }
  0x33   : > { %vm231_vm13 = vmand %vm199_vm15, %vm2943_vm1  ;;  %v176_v59 = vrot.slane %v175_v48, 1  ;;  %v157_v60 = vsel %vm156_vm8, %v125_v34, %v155_v44  ;;  %v3031_v16 = vrot.slane %v2855_v0, %v3017_v62  ;;  %v3034_v24 = vsub.s32 7, %v2735_v2 }
  0x34   : > { %v2958_v45 = vsel %vm231_vm13, 1.0, %v2716_v27  ;;  %v353_v49 = vsel %vm351_vm4, 1.0, %v332_v38  ;;  %v1362_v50 = vsel %vm351_vm4, 1.0, %v1346_v41  ;;  %vm2970_vm15 = vmpackc.low %vm309_vm6, %vm305_vm5  ;;  %v346_v26 = vrot.slane %v2773_v11, 6 }
  0x35   : > { %v331_v51 = vrot.slane %v2958_v45, 7  ;;  %v1345_v54 = vrot.slane %v2958_v45, 4  ;;  %v357_v55 = vsel %vm3627_vm0, %v353_v49, %v344_v32  ;;  %v1366_v58 = vsel %vm3627_vm0, %v1362_v50, %v1354_v35  ;;  %vm2985_vm13 = vmpackc.low %vm1327_vm14, %vm1323_vm11 }
  0x36   : > { %424 = vmatprep.mubr.f32.mxu1 %v357_v55  ;;  %1433 = vmatprep.mubr.f32.mxu0 %v1366_v58  ;;  %vm2544_vm5 = vmpackc.low %vm522_vm3, %vm518_vm12  ;;  %v158_v35 = vrot.slane %v157_v60, 4  ;;  %vm177_vm6 = vcmp.lt.s32.totalorder %v175_v48, %v176_v59  ;;  %vm202_vm3 = vcmp.eq.s32.totalorder %v2735_v2, %v2884_v29  ;;  %v1356_v34 = vrot.slane %v2773_v11, 3 }
  0x37   : > { %v352_v61 = vsel %vm351_vm4, 1.0, %v331_v51  ;;  %v1361_v32 = vsel %vm351_vm4, 1.0, %v1345_v54  ;;  %vm2584_vm11 = vmpackc.low %vm1531_vm9, %vm1527_vm10  ;;  %v178_v8 = vsel %vm177_vm6, %v175_v48, %v176_v59  ;;  %v345_v44 = vrot.slane %v2787_v22, 6 }
  0x38   : > { %v356_v57 = vsel %vm3627_vm0, %v352_v61, %v343_v37  ;;  %v1365_v1 = vsel %vm3627_vm0, %v1361_v32, %v1353_v46  ;;  %vm159_vm14 = vcmp.lt.s32.totalorder %v157_v60, %v158_v35  ;;  %vm198_vm12 = vcmp.eq.s32.totalorder %v178_v8, %v2884_v29 }
  0x39   : > { %425 = vmatmul.mubr.f32.vlgmr.msra.gmra.mrb[0].mxu1 %v356_v57  ;;  %1434 = vmatmul.mubr.f32.vlgmr.msra.gmra.mrb[0].mxu0 %v1365_v1  ;;  %v160_v37 = vsel %vm159_vm14, %v157_v60, %v158_v35  ;;  %v210_v46 = vsel %vm198_vm12, 1, %v2715_v63  ;;  %v504_v48 = vrot.slane %v2801_v40, %v2830_v56  ;;  %v1513_v49 = vrot.slane %v2801_v40, %v2874_v21 }
  0x3a   : > { %2543 = vmatpush1.bf16.xpose.msk.msra.mxu1 %vm2970_vm15, %v2714_v53  ;;  %2583 = vmatpush1.bf16.xpose.msk.msra.mxu0 %vm2985_vm13, %v2714_v53  ;;  %v161_v47 = vrot.slane %v160_v37, 2  ;;  %v226_v33 = vrot.slane %v210_v46, %v2790_v23  ;;  %vm201_vm15 = vcmp.eq.s32.totalorder %v2735_v2, %v3031_v16  ;;  %v516_v43 = vrot.slane %v2803_v42, %v2830_v56 }
  0x3b   : > { %2545 = vmatprep.subr.msk.bf16.mxu1 %vm2544_vm5, %v2714_v53  ;;  %2585 = vmatprep.subr.msk.bf16.mxu0 %vm2584_vm11, %v2714_v53  ;;  %v1355_v60 = vrot.slane %v2787_v22, 3  ;;  %v550_v61 = vsel %vm351_vm4, 1.0, %v2941_v30  ;;  %v1551_v32 = vrot.slane %v2941_v30, 5  ;;  %vm517_vm5 = vcmp.eq.s32.totalorder %v504_v48, %v2735_v2 }
  0x3c   : > { %vm162_vm10 = vcmp.lt.s32.totalorder %v160_v37, %v161_v47  ;;  %vm3023_vm7 = vcmp.eq.s32.totalorder %v226_v33, 1  ;;  %vm521_vm6 = vcmp.eq.s32.totalorder %v504_v48, %v2738_v3  ;;  %vm1526_vm11 = vcmp.eq.s32.totalorder %v1513_v49, %v2735_v2 }
  0x3d   : > { %v163_v10 = vsel %vm162_vm10, %v160_v37, %v161_v47  ;;  %vm234_vm8 = vmand %vm202_vm3, %vm3023_vm7  ;;  %v3639_v35 = vmov 0  ;;  %vm1530_vm12 = vcmp.eq.s32.totalorder %v1513_v49, %v2738_v3  ;;  %v549_v57 = vsel %vm351_vm4, 1.0, %v2958_v45 }
  0x3e   : > { %v164_v15 = vrot.slane %v163_v10, 1  ;;  %v3037_v25 = vsel %vm234_vm8, 1.0, %v2716_v27  ;;  %v1525_v1 = vrot.slane %v2803_v42, %v2874_v21  ;;  %v554_v8 = vsel %vm3627_vm0, %v550_v61, %v542_v52 }
  0x3f   : > { %v334_v38 = vrot.slane %v3037_v25, 7  ;;  %v1348_v41 = vrot.slane %v3037_v25, 4  ;;  %vm520_vm10 = vcmp.eq.s32.totalorder %v516_v43, %v2735_v2  ;;  %v1559_v37 = vrot.slane %v2760_v5, 4 }
  0x40   : > { %vm165_vm9 = vcmp.lt.s32.totalorder %v163_v10, %v164_v15  ;;  %v1550_v46 = vrot.slane %v2958_v45, 5  ;;  %vm524_vm8 = vcmp.eq.s32.totalorder %v516_v43, %v2738_v3  ;;  %v1567_v33 = vsel %vm351_vm4, 1.0, %v1551_v32 }
  0x41   : > { %v166_v0 = vsel %vm165_vm9, %v163_v10, %v164_v15  ;;  %v355_v50 = vsel %vm351_vm4, 1.0, %v334_v38  ;;  %v1364_v51 = vsel %vm351_vm4, 1.0, %v1348_v41  ;;  %v512_v10 = vrot.slane %v2871_v20, %v2830_v56  ;;  %vm3104_vm9 = vmpackc.low %vm521_vm6, %vm517_vm5 }
  0x42   : > { %vm197_vm13 = vcmp.eq.s32.totalorder %v166_v0, %v3031_v16  ;;  %v359_v54 = vsel %vm3627_vm0, %v355_v50, %v346_v26  ;;  %v1368_v55 = vsel %vm3627_vm0, %v1364_v51, %v1356_v34  ;;  %v1558_v38 = vrot.slane %v2763_v6, 4  ;;  %vm3119_vm5 = vmpackc.low %vm1530_vm12, %vm1526_vm11 }
  0x43   : > { %v209_v58 = vsel %vm197_vm13, 1, %v2715_v63  ;;  %494 = vmatprep.mubr.f32.mxu1 %v359_v54  ;;  %1503 = vmatprep.mubr.f32.mxu0 %v1368_v55  ;;  %v541_v63 = vrot.slane %v2763_v6, 7  ;;  %vm1533_vm13 = vcmp.eq.s32.totalorder %v1525_v1, %v2738_v3  ;;  %v1521_v0 = vrot.slane %v2871_v20, %v2874_v21  ;;  %vm3131_vm6 = vmpackc.low %vm524_vm8, %vm520_vm10 }
  0x44   : > { %v222_v59 = vrot.slane %v209_v58, %v2790_v23  ;;  %v1553_v50 = vrot.slane %v3037_v25, 5  ;;  %v1571_v54 = vsel %vm3627_vm0, %v1567_v33, %v1559_v37  ;;  %v1566_v55 = vsel %vm351_vm4, 1.0, %v1550_v46 }
  0x45   : > { %v553_v34 = vsel %vm3627_vm0, %v549_v57, %v541_v63  ;;  %v544_v49 = vrot.slane %v2773_v11, 7  ;;  %v705_v61 = vrot.slane %v2799_v39, %v3017_v62  ;;  %vm519_vm11 = vcmp.eq.s32.totalorder %v512_v10, %v2735_v2 }
  0x46   : > { %vm3071_vm14 = vcmp.eq.s32.totalorder %v222_v59, 1  ;;  %vm523_vm12 = vcmp.eq.s32.totalorder %v512_v10, %v2738_v3  ;;  %v552_v43 = vsel %vm351_vm4, 1.0, %v3037_v25  ;;  %v1570_v32 = vsel %vm3627_vm0, %v1566_v55, %v1558_v38 }
  0x47   : > { %v3640_v35 = vsel %vm3071_vm14, 4294967295, %v3639_v35  ;;  %vm233_vm3 = vmand %vm201_vm15, %vm3071_vm14  ;;  %vm1529_vm15 = vcmp.eq.s32.totalorder %v1525_v1, %v2735_v2  ;;  %vm1528_vm10 = vcmp.eq.s32.totalorder %v1521_v0, %v2735_v2  ;;  %v1569_v63 = vsel %vm351_vm4, 1.0, %v1553_v50 }
  0x48   : > { %v3090_v47 = vsel %vm233_vm3, 1.0, %v2716_v27  ;;  %vm3144_vm3 = vmpackc.low %vm1533_vm13, %vm1529_vm15  ;;  %v1722_v57 = vrot.slane %v2799_v39, %v3034_v24  ;;  %vm1532_vm8 = vcmp.eq.s32.totalorder %v1521_v0, %v2738_v3  ;;  %v701_v1 = vrot.slane %v2801_v40, %v3017_v62 }
  0x49   : > { %v333_v15 = vrot.slane %v3090_v47, 7  ;;  %v1347_v26 = vrot.slane %v3090_v47, 4  ;;  %v1718_v37 = vrot.slane %v2801_v40, %v3034_v24  ;;  %v739_v46 = vrot.slane %v2941_v30, 1  ;;  %vm3187_vm13 = vmpackc.low %vm523_vm12, %vm519_vm11 }
  0x4a   : > { %v543_v33 = vrot.slane %v2787_v22, 7  ;;  %vm719_vm15 = vcmp.eq.s32.totalorder %v705_v61, %v2738_v3  ;;  %v551_v38 = vsel %vm351_vm4, 1.0, %v3090_v47  ;;  %v1756_v41 = vrot.slane %v2941_v30, 6 }
  0x4b   : > { %v354_v51 = vsel %vm351_vm4, 1.0, %v333_v15  ;;  %v1363_v52 = vsel %vm351_vm4, 1.0, %v1347_v26  ;;  %v1552_v15 = vrot.slane %v3090_v47, 5  ;;  %vm714_vm11 = vcmp.eq.s32.totalorder %v701_v1, %v2735_v2 }
  0x4c   : > { %v358_v21 = vsel %vm3627_vm0, %v354_v51, %v345_v44  ;;  %v1367_v58 = vsel %vm3627_vm0, %v1363_v52, %v1355_v60  ;;  %v1561_v60 = vrot.slane %v2773_v11, 4  ;;  %v1560_v51 = vrot.slane %v2787_v22, 4 }
  0x4d   : > { %495 = vmatmul.mubr.f32.vlgmr.msra.gmra.mrb[0].mxu1 %v358_v21  ;;  %1504 = vmatmul.mubr.f32.vlgmr.msra.gmra.mrb[0].mxu0 %v1367_v58  ;;  %v713_v52 = vrot.slane %v2803_v42, %v3017_v62  ;;  %vm718_vm12 = vcmp.eq.s32.totalorder %v701_v1, %v2738_v3  ;;  %v747_v10 = vsel %vm351_vm4, 1.0, %v739_v46  ;;  %vm3655_vm14 = vcmask 1041408  }
  0x4e   : > { %2547 = vmatpush1.bf16.xpose.msk.msra.mxu1 %vm3104_vm9, %v2714_v53  ;;  %2587 = vmatpush1.bf16.xpose.msk.msra.mxu0 %vm3119_vm5, %v2714_v53  ;;  %vm715_vm9 = vcmp.eq.s32.totalorder %v705_v61, %v2735_v2  ;;  %v1573_v26 = vsel %vm3627_vm0, %v1569_v63, %v1561_v60  ;;  %v555_v0 = vsel %vm3655_vm14, %v551_v38, %v543_v33  ;;  %v1568_v55 = vsel %vm351_vm4, 1.0, %v1552_v15 }
  0x4f   : > { %621 = vmatprep.mubr.f32.mxu1 %v554_v8  ;;  %2549 = vmatprep.subr.msk.bf16.mxu1 %vm3131_vm6, %v2714_v53  ;;  %v556_v8 = vsel %vm3627_vm0, %v552_v43, %v544_v49  ;;  %vm1736_vm6 = vcmp.eq.s32.totalorder %v1722_v57, %v2738_v3  ;;  %vm3210_vm5 = vmpackc.low %vm719_vm15, %vm715_vm9  ;;  %v1764_v21 = vrot.slane %v2760_v5, 5  ;;  %v1772_v59 = vsel %vm351_vm4, 1.0, %v1756_v41 }
  0x50   : > { %1638 = vmatprep.mubr.f32.mxu0 %v1571_v54  ;;  %2589 = vmatprep.subr.msk.bf16.mxu0 %vm3144_vm3, %v2714_v53  ;;  %vm3200_vm3 = vmpackc.low %vm1532_vm8, %vm1528_vm10  ;;  %vm1735_vm10 = vcmp.eq.s32.totalorder %v1718_v37, %v2738_v3  ;;  %vm3656_vm8 = vcmp.eq.s32.totalorder %v1722_v57, %v2735_v2  ;;  %v738_v49 = vrot.slane %v2958_v45, 1  ;;  %v3228_v61 = vrot.slane %v2871_v20, %v3017_v62 }
  0x51   : > { %vm3220_vm0 = vmpackc.low %vm1736_vm6, %vm3656_vm8  ;;  %v260_v44 = vmul.f32 10.0, %v2766_v7  ;;  %v1755_v43 = vrot.slane %v2958_v45, 6  ;;  %v1730_v60 = vrot.slane %v2803_v42, %v3034_v24  ;;  %v259_v62 = vmul.f32 10.0, %v2778_v14 }
  0x52   : > { %vm717_vm9 = vcmp.eq.s32.totalorder %v713_v52, %v2735_v2  ;;  %vm721_vm15 = vcmp.eq.s32.totalorder %v713_v52, %v2738_v3  ;;  %v746_v15 = vsel %vm351_vm4, 1.0, %v738_v49  ;;  %v1726_v38 = vrot.slane %v2871_v20, %v3034_v24 }
  0x53   : > { %v268_v63 = vceil.f32 %v260_v44  ;;  %v267_v33 = vceil.f32 %v259_v62  ;;  %v1771_v50 = vsel %vm351_vm4, 1.0, %v1755_v43  ;;  %vm1738_vm8 = vcmp.eq.s32.totalorder %v1730_v60, %v2738_v3 }
  0x54   : > { %v902_v48 = vrot.slane %v2799_v39, %v2862_v12  ;;  %v262_v58 = vmul.f32 10.0, %v2783_v18  ;;  %v740_v49 = vrot.slane %v3090_v47, 1  ;;  %v1766_v43 = vrot.slane %v2773_v11, 5 }
  0x55   : > { %622 = vmatmul.mubr.f32.vlgmr.msra.gmra.mrb[0].mxu1 %v553_v34  ;;  %1639 = vmatmul.mubr.f32.vlgmr.msra.gmra.mrb[0].mxu0 %v1570_v32  ;;  %v751_v34 = vsel %vm3655_vm14, %v747_v10, %v2760_v5  ;;  %v741_v32 = vrot.slane %v3037_v25, 1  ;;  %v910_v41 = vrot.slane %v2803_v42, %v2862_v12  ;;  %v936_v31 = vrot.slane %v2941_v30, 2 }
  0x56   : > { %2551 = vmatpush1.bf16.xpose.msk.msra.mxu1 %vm3187_vm13, %v2714_v53  ;;  %2591 = vmatpush1.bf16.xpose.msk.msra.mxu0 %vm3200_vm3, %v2714_v53  ;;  %vm3659_vm13 = vmmov %vm3655_vm14  ;;  %vm3663_vm14 = vcmp.eq.s32.totalorder %v1718_v37, %v2735_v2  ;;  %v270_v62 = vceil.f32 %v262_v58 }
  0x57   : > { %691 = vmatprep.mubr.f32.mxu1 %v556_v8  ;;  %2553 = vmatprep.subr.msk.bf16.mxu1 %vm3210_vm5, %v2714_v53  ;;  %v1572_v57 = vsel %vm3659_vm13, %v1568_v55, %v1560_v51  ;;  %vm3660_vm6 = vmmov %vm3659_vm13  ;;  %v1763_v8 = vrot.slane %v2763_v6, 5  ;;  %vm716_vm5 = vcmp.eq.s32.totalorder %v3228_v61, %v2735_v2  ;;  %v2662_v51 = vtrunc.f32 %v267_v33 }
  0x58   : > { %1708 = vmatprep.mubr.f32.mxu0 %v1573_v26  ;;  %2593 = vmatprep.subr.msk.bf16.mxu0 %vm3220_vm0, %v2714_v53  ;;  %v1776_v46 = vsel %vm3660_vm6, %v1772_v59, %v1764_v21  ;;  %v2664_v26 = vtrunc.f32 %v268_v63  ;;  %vm3264_vm3 = vmpackc.low %vm718_vm12, %vm714_vm11  ;;  %vm1734_vm0 = vcmp.eq.s32.totalorder %v1730_v60, %v2735_v2  ;;  %vm720_vm11 = vcmp.eq.s32.totalorder %v3228_v61, %v2738_v3 }
  0x59   : > { %vm3275_vm13 = vmpackc.low %vm1735_vm10, %vm3663_vm14  ;;  %v749_v1 = vsel %vm351_vm4, 1.0, %v741_v32  ;;  %v1758_v55 = vrot.slane %v3037_v25, 6  ;;  %v2663_v21 = vcvt.f32.s32 %v2662_v51  ;;  %v1775_v59 = vsel %vm3660_vm6, %v1771_v50, %v1763_v8 }
  0x5a   : > { %v2665_v10 = vcvt.f32.s32 %v2664_v26  ;;  %vm3288_vm12 = vmpackc.low %vm721_vm15, %vm717_vm9  ;;  %vm204_vm15 = vcmp.eq.s32.totalorder %v2738_v3, %v2869_v17  ;;  %v261_v32 = vmul.f32 10.0, %v2865_v13  ;;  %v898_v63 = vrot.slane %v2801_v40, %v2862_v12 }
  0x5b   : > { %vm3668_vm10 = vmmov %vm3660_vm6  ;;  %v748_v8 = vsel %vm351_vm4, 1.0, %v740_v49  ;;  %v1757_v33 = vrot.slane %v3090_v47, 6  ;;  %v2668_v19 = vtrunc.f32 %v270_v62  ;;  %v1765_v61 = vrot.slane %v2787_v22, 5 }
  0x5c   : > { %v750_v37 = vsel %vm3668_vm10, %v746_v15, %v2763_v6  ;;  %vm3301_vm9 = vmpackc.low %vm1738_vm8, %vm1734_vm0  ;;  %v3306_v44 = vadd.s32 4294967295, %v2665_v10  ;;  %vm1733_vm0 = vcmp.eq.s32.totalorder %v1726_v38, %v2735_v2  ;;  %vm1737_vm8 = vcmp.eq.s32.totalorder %v1726_v38, %v2738_v3 }
  0x5d   : > { %692 = vmatmul.mubr.f32.vlgmr.msra.gmra.mrb[0].mxu1 %v555_v0  ;;  %1709 = vmatmul.mubr.f32.vlgmr.msra.gmra.mrb[0].mxu0 %v1572_v57  ;;  %vm3671_vm14 = vmmov %vm3660_vm6  ;;  %v3335_v57 = vadd.s32 4294967295, %v2663_v21  ;;  %vm203_vm6 = vcmp.eq.s32.totalorder %v2738_v3, %v2880_v28  ;;  %v269_v15 = vceil.f32 %v261_v32  ;;  %v2669_v51 = vcvt.f32.s32 %v2668_v19 }
  0x5e   : > { %2555 = vmatpush1.bf16.xpose.msk.msra.mxu1 %vm3264_vm3, %v2714_v53  ;;  %2595 = vmatpush1.bf16.xpose.msk.msra.mxu0 %vm3275_vm13, %v2714_v53  ;;  %v753_v0 = vsel %vm3671_vm14, %v749_v1, %v2773_v11  ;;  %vm912_vm3 = vcmp.eq.s32.totalorder %v902_v48, %v2735_v2  ;;  %v1927_v60 = vrot.slane %v3306_v44, %v2790_v23  ;;  %vm3348_vm10 = vmpackc.low %vm720_vm11, %vm716_vm5  ;;  %v1977_v62 = vrot.slane %v2766_v7, 6 }
  0x5f   : > { %818 = vmatprep.mubr.f32.mxu1 %v751_v34  ;;  %2557 = vmatprep.subr.msk.bf16.mxu1 %vm3288_vm12, %v2714_v53  ;;  %vm916_vm13 = vcmp.eq.s32.totalorder %v902_v48, %v2738_v3  ;;  %v1774_v34 = vsel %vm351_vm4, 1.0, %v1758_v55  ;;  %vm236_vm12 = vmand %vm204_vm15, %vm2925_vm2  ;;  %v1923_v1 = vrot.slane %v3335_v57, %v2790_v23  ;;  %v2666_v10 = vtrunc.f32 %v269_v15 }
  0x60   : > { %1843 = vmatprep.mubr.f32.mxu0 %v1776_v46  ;;  %2597 = vmatprep.subr.msk.bf16.mxu0 %vm3301_vm9, %v2714_v53  ;;  %vm3360_vm2 = vmpackc.low %vm1737_vm8, %vm1733_vm0  ;;  %vm1937_vm5 = vcmp.eq.s32.totalorder %v1927_v60, %v2735_v2  ;;  %vm1941_vm11 = vcmp.eq.s32.totalorder %v1927_v60, %v2738_v3  ;;  %v3379_v50 = vsel %vm236_vm12, 1.0, %v2716_v27  ;;  %vm911_vm8 = vcmp.eq.s32.totalorder %v898_v63, %v2735_v2 }
  0x61   : > { %vm3371_vm9 = vmpackc.low %vm916_vm13, %vm912_vm3  ;;  %vm915_vm3 = vcmp.eq.s32.totalorder %v898_v63, %v2738_v3  ;;  %v3405_v28 = vadd.s32 4294967295, %v2669_v51  ;;  %v944_v55 = vrot.slane %v2760_v5, 1  ;;  %v1965_v21 = vrot.slane %v3379_v50, 7 }
  0x62   : > { %vm3678_vm15 = vmmov %vm3671_vm14  ;;  %v2667_v58 = vcvt.f32.s32 %v2666_v10  ;;  %vm914_vm12 = vcmp.eq.s32.totalorder %v910_v41, %v2735_v2  ;;  %v952_v60 = vsel %vm351_vm4, 1.0, %v936_v31  ;;  %v943_v32 = vrot.slane %v2763_v6, 1 }
  0x63   : > { %v1778_v38 = vsel %vm3678_vm15, %v1774_v34, %v1766_v43  ;;  %vm3679_vm0 = vmmov %vm3671_vm14  ;;  %v1935_v52 = vrot.slane %v3405_v28, %v2790_v23  ;;  %vm205_vm15 = vcmp.eq.s32.totalorder %v2738_v3, %v3031_v16  ;;  %v1985_v9 = vsel %vm351_vm4, 1.0, %v1965_v21  ;;  %v2691_v21 = vld [vmem:[%s2757_s17 + $0x208] sm:$0x3] }
  0x64   : > { %v752_v24 = vsel %vm3679_vm0, %v748_v8, %v2787_v22  ;;  %vm3391_vm14 = vmand %vm203_vm6, %vm2943_vm1  ;;  %vm206_vm1 = vcmp.eq.s32.totalorder %v2738_v3, %v2884_v29  ;;  %vm1936_vm6 = vcmp.eq.s32.totalorder %v1923_v1, %v2735_v2  ;;  %v3436_v49 = vadd.s32 4294967295, %v2667_v58 }
  0x65   : > { %819 = vmatmul.mubr.f32.vlgmr.msra.gmra.mrb[0].mxu1 %v750_v37  ;;  %1844 = vmatmul.mubr.f32.vlgmr.msra.gmra.mrb[0].mxu0 %v1775_v59  ;;  %vm3400_vm13 = vmpackc.low %vm1941_vm11, %vm1937_vm5  ;;  %v1773_v37 = vsel %vm351_vm4, 1.0, %v1757_v33  ;;  %v935_v59 = vrot.slane %v2958_v45, 2  ;;  %v3434_v5 = vsel %vm3391_vm14, 1.0, %v2716_v27  ;;  %v906_v16 = vrot.slane %v2871_v20, %v2862_v12 }
  0x66   : > { %2559 = vmatpush1.bf16.xpose.msk.msra.mxu1 %vm3348_vm10, %v2714_v53  ;;  %2599 = vmatpush1.bf16.xpose.msk.msra.mxu0 %vm3360_vm2, %v2714_v53  ;;  %vm918_vm10 = vcmp.eq.s32.totalorder %v910_v41, %v2738_v3  ;;  %vm1940_vm2 = vcmp.eq.s32.totalorder %v1923_v1, %v2738_v3  ;;  %vm238_vm5 = vmand %vm206_vm1, %vm3023_vm7  ;;  %v1964_v34 = vrot.slane %v3434_v5, 7  ;;  %v1931_v6 = vrot.slane %v3436_v49, %v2790_v23 }
  0x67   : > { %888 = vmatprep.mubr.f32.mxu1 %v753_v0  ;;  %2561 = vmatprep.subr.msk.bf16.mxu1 %vm3371_vm9, %v2714_v53  ;;  %vm3447_vm11 = vmpackc.low %vm915_vm3, %vm911_vm8  ;;  %vm1943_vm8 = vcmp.eq.s32.totalorder %v1935_v52, %v2738_v3  ;;  %v951_v7 = vsel %vm351_vm4, 1.0, %v935_v59  ;;  %v3475_v63 = vsel %vm238_vm5, 1.0, %v2716_v27  ;;  %v938_v8 = vrot.slane %v3037_v25, 2 }
  0x68   : > { %1913 = vmatprep.mubr.f32.mxu0 %v1778_v38  ;;  %2601 = vmatprep.subr.msk.bf16.mxu0 %vm3400_vm13, %v2714_v53  ;;  %vm3686_vm9 = vmmov %vm3679_vm0  ;;  %vm1939_vm0 = vcmp.eq.s32.totalorder %v1935_v52, %v2735_v2  ;;  %vm3690_vm13 = vnez %v3640_v35  ;;  %v1107_v19 = vrot.slane %v2799_v39, %v3042_v36  ;;  %v1976_v35 = vrot.slane %v2778_v14, 6 }
  0x69   : > { %v1777_v43 = vsel %vm3686_vm9, %v1773_v37, %v1765_v61  ;;  %vm3460_vm7 = vmpackc.low %vm918_vm10, %vm914_vm12  ;;  %v1967_v17 = vrot.slane %v3475_v63, 7  ;;  %v2140_v61 = vrot.slane %v3306_v44, %v2830_v56  ;;  %vm917_vm5 = vcmp.eq.s32.totalorder %v906_v16, %v2738_v3 }
  0x6a   : > { %vm2602_vm14 = vmpackc.low %vm1940_vm2, %vm1936_vm6  ;;  %vm913_vm2 = vcmp.eq.s32.totalorder %v906_v16, %v2735_v2  ;;  %v1984_v39 = vsel %vm351_vm4, 1.0, %v1964_v34  ;;  %v946_v15 = vrot.slane %v2773_v11, 1  ;;  %v954_v14 = vsel %vm351_vm4, 1.0, %v938_v8  ;;  %v2695_v16 = vld [vmem:[%s2757_s17 + $0x218] sm:$0x3] }
  0x6b   : > { %vm3689_vm3 = vmmov %vm3686_vm9  ;;  %vm1942_vm9 = vcmp.eq.s32.totalorder %v1931_v6, %v2738_v3  ;;  %v1979_v11 = vrot.slane %v2783_v18, 6  ;;  %v937_v26 = vrot.slane %v3090_v47, 2  ;;  %v1987_v51 = vsel %vm351_vm4, 1.0, %v1967_v17 }
  0x6c   : > { %v956_v46 = vsel %vm3689_vm3, %v952_v60, %v944_v55  ;;  %vm3483_vm1 = vmand %vm205_vm15, %vm3690_vm13  ;;  %vm1117_vm15 = vcmp.eq.s32.totalorder %v1107_v19, %v2735_v2  ;;  %v945_v1 = vrot.slane %v2787_v22, 1  ;;  %v2136_v48 = vrot.slane %v3335_v57, %v2830_v56 }
  0x6d   : > { %889 = vmatmul.mubr.f32.vlgmr.msra.gmra.mrb[0].mxu1 %v752_v24  ;;  %1914 = vmatmul.mubr.f32.vlgmr.msra.gmra.mrb[0].mxu0 %v1777_v43  ;;  %vm3693_vm12 = vmmov %vm3689_vm3  ;;  %v3513_v44 = vsel %vm3483_vm1, 1.0, %v2716_v27  ;;  %v1103_v27 = vrot.slane %v2801_v40, %v3042_v36  ;;  %v953_v54 = vsel %vm351_vm4, 1.0, %v937_v26  ;;  %v1141_v31 = vrot.slane %v2941_v30, 3 }
  0x6e   : > { %v1989_v12 = vsel %vm3693_vm12, %v1985_v9, %v1977_v62  ;;  %vm2604_vm10 = vmpackc.low %vm1943_vm8, %vm1939_vm0  ;;  %2563 = vmatpush1.bf16.xpose.msk.msra.mxu1 %vm3447_vm11, %v2714_v53  ;;  %2603 = vmatpush1.bf16.xpose.msk.msra.mxu0 %vm2602_vm14, %v2714_v53  ;;  %vm1938_vm11 = vcmp.eq.s32.totalorder %v1931_v6, %v2735_v2  ;;  %vm2150_vm14 = vcmp.eq.s32.totalorder %v2140_v61, %v2735_v2  ;;  %v1966_v18 = vrot.slane %v3513_v44, 7 }
  0x6f   : > { %vm3694_vm6 = vmmov %vm3689_vm3  ;;  %1023 = vmatprep.mubr.f32.mxu1 %v956_v46  ;;  %2565 = vmatprep.subr.msk.bf16.mxu1 %vm3460_vm7, %v2714_v53  ;;  %vm1121_vm7 = vcmp.eq.s32.totalorder %v1107_v19, %v2738_v3  ;;  %v1115_v40 = vrot.slane %v2803_v42, %v3042_v36  ;;  %v1978_v22 = vrot.slane %v2865_v13, 6  ;;  %v2148_v57 = vrot.slane %v3405_v28, %v2830_v56  ;;  %v2690_v28 = vld [vmem:[%s2757_s17 + $0x8] sm:$0xff] }
  0x70   : > { %v955_v23 = vsel %vm3694_vm6, %v951_v7, %v943_v32  ;;  %2056 = vmatprep.mubr.f32.mxu0 %v1989_v12  ;;  %2605 = vmatprep.subr.msk.bf16.mxu0 %vm2604_vm10, %v2714_v53  ;;  %vm3519_vm0 = vmpackc.low %vm917_vm5, %vm913_vm2  ;;  %vm1116_vm2 = vcmp.eq.s32.totalorder %v1103_v27, %v2735_v2  ;;  %vm1120_vm5 = vcmp.eq.s32.totalorder %v1103_v27, %v2738_v3  ;;  %v1986_v42 = vsel %vm351_vm4, 1.0, %v1966_v18 }
  0x71   : > { %vm3697_vm8 = vmmov %vm3689_vm3  ;;  %vm2154_vm3 = vcmp.eq.s32.totalorder %v2140_v61, %v2738_v3  ;;  %v1149_v37 = vrot.slane %v2690_v28, 2  ;;  %v1157_v55 = vsel %vm351_vm4, 1.0, %v1141_v31  ;;  %v2174_v58 = vrot.slane %v2691_v21, 7 }
  0x72   : > { %v1988_v41 = vsel %vm3697_vm8, %v1984_v39, %v1976_v35  ;;  %vm2606_vm13 = vmpackc.low %vm1942_vm9, %vm1938_vm11  ;;  %vm2149_vm9 = vcmp.eq.s32.totalorder %v2136_v48, %v2735_v2  ;;  %v2182_v0 = vsel %vm351_vm4, 1.0, %v3379_v50  ;;  %v1140_v43 = vrot.slane %v2958_v45, 3 }
  0x73   : > { %vm3698_vm1 = vmmov %vm3694_vm6  ;;  %v1111_v60 = vrot.slane %v2871_v20, %v3042_v36  ;;  %v2144_v29 = vrot.slane %v3436_v49, %v2830_v56  ;;  %v1143_v9 = vrot.slane %v3037_v25, 3  ;;  %v2692_v20 = vld [vmem:[%s2757_s17] sm:$0xff]  ;;  %v2181_v25 = vsel %vm351_vm4, 1.0, %v3434_v5  ;;  %v2694_v49 = vld [vmem:[%s2757_s17 + $0x18] sm:$0xff] }
  0x74   : > { %v958_v24 = vsel %vm3698_vm1, %v954_v14, %v946_v15  ;;  %vm2568_vm12 = vmpackc.low %vm1121_vm7, %vm1117_vm15  ;;  %vm2153_vm15 = vcmp.eq.s32.totalorder %v2136_v48, %v2738_v3  ;;  %vm1119_vm7 = vcmp.eq.s32.totalorder %v1115_v40, %v2735_v2  ;;  %v1148_v45 = vrot.slane %v2692_v20, 2  ;;  %v2693_v36 = vld [vmem:[%s2757_s17 + $0x200] sm:$0x3] }
  0x75   : > { %1024 = vmatmul.mubr.f32.vlgmr.msra.gmra.mrb[0].mxu1 %v955_v23  ;;  %2057 = vmatmul.mubr.f32.vlgmr.msra.gmra.mrb[0].mxu0 %v1988_v41  ;;  %vm3699_vm10 = vmmov %vm3698_vm1  ;;  %v2173_v32 = vrot.slane %v2693_v36, 7  ;;  %v1156_v56 = vsel %vm351_vm4, 1.0, %v1140_v43  ;;  %v1151_v7 = vrot.slane %v2694_v49, 2  ;;  %v2176_v34 = vrot.slane %v2695_v16, 7  ;;  %v2696_v23 = vld [vmem:[%s2757_s17 + $0x10] sm:$0xff] }
  0x76   : > { %v1991_v10 = vsel %vm3699_vm10, %v1987_v51, %v1979_v11  ;;  %vm2608_vm6 = vmpackc.low %vm2154_vm3, %vm2150_vm14  ;;  %2567 = vmatpush1.bf16.xpose.msk.msra.mxu1 %vm3519_vm0, %v2714_v53  ;;  %2607 = vmatpush1.bf16.xpose.msk.msra.mxu0 %vm2606_vm13, %v2714_v53  ;;  %vm1123_vm0 = vcmp.eq.s32.totalorder %v1115_v40, %v2738_v3  ;;  %vm2152_vm3 = vcmp.eq.s32.totalorder %v2148_v57, %v2735_v2  ;;  %v1159_v46 = vsel %vm351_vm4, 1.0, %v1143_v9 }
  0x77   : > { %1093 = vmatprep.mubr.f32.mxu1 %v958_v24  ;;  %2569 = vmatprep.subr.msk.bf16.mxu1 %vm2568_vm12, %v2714_v53  ;;  %vm3700_vm11 = vmmov %vm3698_vm1  ;;  %vm2156_vm13 = vcmp.eq.s32.totalorder %v2148_v57, %v2738_v3  ;;  %v2184_v6 = vsel %vm351_vm4, 1.0, %v3475_v63  ;;  %v1142_v33 = vrot.slane %v3090_v47, 3  ;;  %v1150_v63 = vrot.slane %v2696_v23, 2 }
  0x78   : > { %2126 = vmatprep.mubr.f32.mxu0 %v1991_v10  ;;  %v957_v30 = vsel %vm3700_vm11, %v953_v54, %v945_v1  ;;  %2609 = vmatprep.subr.msk.bf16.mxu0 %vm2608_vm6, %v2714_v53  ;;  %vm3561_vm8 = vmpackc.low %vm1120_vm5, %vm1116_vm2  ;;  %vm1118_vm5 = vcmp.eq.s32.totalorder %v1111_v60, %v2735_v2  ;;  %v2175_v35 = vrot.slane %v2865_v13, 7  ;;  %v2183_v47 = vsel %vm351_vm4, 1.0, %v3513_v44  ;;  %v2330_v44 = vld [vmem:[%s3626_s2] sm:$0x7] (%p62_p0) }
  0x79   : > { %vm3703_vm14 = vmmov %vm3698_vm1  ;;  %v1158_v17 = vsel %vm351_vm4, 1.0, %v1142_v33  ;;  %vm2332_vm4 = vcmask (%p62_p0), 124928  }
  0x7a   : > { %v1990_v52 = vsel %vm3703_vm14, %v1986_v42, %v1978_v22  ;;  %vm2610_vm1 = vmpackc.low %vm2153_vm15, %vm2149_vm9  ;;  %vm2151_vm9 = vcmp.eq.s32.totalorder %v2144_v29, %v2735_v2  ;;  %vm2155_vm15 = vcmp.eq.s32.totalorder %v2144_v29, %v2738_v3 }
  0x7b   : > { %vm3704_vm12 = vmmov %vm3699_vm10 }
  0x7c   : > { %v1161_v62 = vsel %vm3704_vm12, %v1157_v55, %v1149_v37  ;;  %vm2572_vm10 = vmpackc.low %vm1123_vm0, %vm1119_vm7 }
  0x7d   : > { %1094 = vmatmul.mubr.f32.vlgmr.msra.gmra.mrb[0].mxu1 %v957_v30  ;;  %2127 = vmatmul.mubr.f32.vlgmr.msra.gmra.mrb[0].mxu0 %v1990_v52  ;;  %vm3705_vm6 = vmmov %vm3700_vm11  ;;  %vm1122_vm11 = vcmp.eq.s32.totalorder %v1111_v60, %v2738_v3 }
  0x7e   : > { %v2186_v50 = vsel %vm3705_vm6, %v2182_v0, %v2174_v58  ;;  %vm2612_vm2 = vmpackc.low %vm2156_vm13, %vm2152_vm3  ;;  %2571 = vmatpush1.bf16.xpose.msk.msra.mxu1 %vm3561_vm8, %v2714_v53  ;;  %2611 = vmatpush1.bf16.xpose.msk.msra.mxu0 %vm2610_vm1, %v2714_v53 }
  0x7f   : > { %1228 = vmatprep.mubr.f32.mxu1 %v1161_v62  ;;  %2573 = vmatprep.subr.msk.bf16.mxu1 %vm2572_vm10, %v2714_v53  ;;  %vm3706_vm7 = vmmov %vm3705_vm6 }
  0x80   : > { %2253 = vmatprep.mubr.f32.mxu0 %v2186_v50  ;;  %2613 = vmatprep.subr.msk.bf16.mxu0 %vm2612_vm2, %v2714_v53  ;;  %v1160_v8 = vsel %vm3706_vm7, %v1156_v56, %v1148_v45  ;;  %vm2574_vm0 = vmpackc.low %vm1122_vm11, %vm1118_vm5 }
  0x81   : > { %vm3707_vm8 = vmmov %vm3705_vm6 }
  0x82   : > { %v2185_v5 = vsel %vm3707_vm8, %v2181_v25, %v2173_v32  ;;  %vm2614_vm14 = vmpackc.low %vm2155_vm15, %vm2151_vm9 }
  0x83   : > { %vm3708_vm3 = vmmov %vm3705_vm6 }
  0x84   : > { %v1163_v12 = vsel %vm3708_vm3, %v1159_v46, %v1151_v7  ;;  %vm3709_vm13 = vmmov %vm3708_vm3 }
  0x85   : > { %v2188_v19 = vsel %vm3709_vm13, %v2184_v6, %v2176_v34  ;;  %1229 = vmatmul.mubr.f32.vlgmr.msra.gmra.mrb[0].mxu1 %v1160_v8  ;;  %2254 = vmatmul.mubr.f32.vlgmr.msra.gmra.mrb[0].mxu0 %v2185_v5  ;;  %vm3710_vm1 = vmmov %vm3708_vm3 }
  0x86   : > { %2575 = vmatpush1.bf16.xpose.msk.msra.mxu1 %vm2574_vm0, %v2714_v53  ;;  %2615 = vmatpush1.bf16.xpose.msk.msra.mxu0 %vm2614_vm14, %v2714_v53  ;;  %v1162_v61 = vsel %vm3710_vm1, %v1158_v17, %v1150_v63  ;;  %vm3711_vm12 = vmmov %vm3710_vm1 }
  0x87   : > { %1298 = vmatprep.mubr.f32.mxu1 %v1163_v12  ;;  %2323 = vmatprep.mubr.f32.mxu0 %v2188_v19  ;;  %v2187_v39 = vsel %vm3711_vm12, %v2183_v47, %v2175_v35 }
  0x8d   : > { %1299 = vmatmul.mubr.f32.vlgmr.msra.gmra.mrb[0].mxu1 %v1162_v61  ;;  %2324 = vmatmul.mubr.f32.vlgmr.msra.gmra.mrb[0].mxu0 %v2187_v39 }
 0x15f   :  { %64 = sbr.rel (!%p62_p0) target bundleno = 5 (0x5), region = 47 }
 0x160   : > { %v1300_v15 = vpop.f32.mrb[0].mxu1  ;;  %v2325_v14 = vpop.f32.mrb[0].mxu0 }
 0x161   : > { %v2616_v53 = vadd.f32 %v2707_v4, %v1300_v15  ;;  %v1302_v11 = vpop.f32.mrb[1].mxu1  ;;  %v2327_v26 = vpop.f32.mrb[1].mxu0 }
 0x163   : > { %v2617_v13 = vadd.f32 %v2616_v53, %v2325_v14  }
 0x165   : > { %v3712_v4 = vmov %v2617_v13  ;;  %v2331_v38 = vadd.f32 (%p62_p0), %v2617_v13, %v2330_v44 }
 0x167   :  { %2333 = vst.msk [vmem:[%s3626_s2] sm:$0x7] %vm2332_vm4, %v2331_v38 }

</bundles_post_ra>
